<compile_context>
chip_gen: v5e
topology: v5e:2x2
jax: 0.10.0
libtpu: 0.0.40
codegen_flags: <defaults>
</compile_context>

<pallas_src>
from functools import partial

import jax
import jax.numpy as jnp
from jax import lax
from jax.experimental import pallas as pl
from jax.experimental.pallas import tpu as pltpu


def _round_up(x, m):
    return ((x + m - 1) // m) * m


def _sampling_matmul_kernel(a_ref, w_ref, o_ref):
    # One full-K MXU pass per M tile: (tm, K) x (K, Npad) -> f32 accumulate.
    o_ref[...] = jnp.dot(
        a_ref[...], w_ref[...], preferred_element_type=jnp.float32
    ).astype(o_ref.dtype)


def patch_matmul(patches, w_t, *, tm_max=1024, out_dtype=jnp.float32):
    """patches: (M, K), w_t: (K, N) -> (M, N) in out_dtype (f32 accumulation)."""
    M, K = patches.shape
    K2, N = w_t.shape
    assert K == K2

    # Lane-dense output: pad N up to a multiple of 128 with zero columns.
    n_pad = _round_up(N, 128)
    if n_pad != N:
        w_t = jnp.pad(w_t, ((0, 0), (0, n_pad - N)))

    # VMEM-aware cap on the M tile: A (2 bufs) + out (2 bufs) per row, plus
    # the resident single-buffered weight, kept under ~12 MiB so the default
    # scoped-VMEM limit is safe on v5e/v6e/v7x.
    a_bytes = jnp.dtype(patches.dtype).itemsize
    w_bytes = jnp.dtype(w_t.dtype).itemsize
    o_bytes = jnp.dtype(out_dtype).itemsize
    per_row = 2 * K * a_bytes + 2 * n_pad * o_bytes
    budget = 12 * 1024 * 1024 - K * n_pad * w_bytes
    tm_cap = max(16, min(tm_max, (max(budget, 0) // per_row) // 16 * 16))

    # M tiling: big tiles amortize the ~0.35us/step grid overhead, but keep
    # the grid >= 2 steps for moderate M so both v7x TensorCores get work.
    if M <= 32:
        tm = max(16, _round_up(M, 16))          # tiny problem: single step
    else:
        tm = max(16, min(tm_cap, _round_up((M + 1) // 2, 16)))
    m_pad = _round_up(M, tm)
    if m_pad != M:
        patches = jnp.pad(patches, ((0, m_pad - M), (0, 0)))

    out = pl.pallas_call(
        _sampling_matmul_kernel,
        out_shape=jax.ShapeDtypeStruct((m_pad, n_pad), out_dtype),
        grid_spec=pltpu.PrefetchScalarGridSpec(
            num_scalar_prefetch=0,
            grid=(m_pad // tm,),
            in_specs=[
                pl.BlockSpec((tm, K), lambda i: (i, 0)),
                # Constant block index => weight resident in VMEM, DMA'd once.
                # It never changes, so single-buffer it (frees ~K*Npad bytes).
                pl.BlockSpec((K, n_pad), lambda i: (0, 0),
                             pipeline_mode=pl.Buffered(1)),
            ],
            out_specs=pl.BlockSpec((tm, n_pad), lambda i: (i, 0)),
        ),
        compiler_params=pltpu.CompilerParams(
            dimension_semantics=("parallel",)),
    )(patches, w_t)

    return out[:M, :N]


@partial(jax.jit, static_argnames=("compute_dtype", "out_dtype"))
def sampling_forward(x, weight, *, compute_dtype=jnp.bfloat16,
                     out_dtype=jnp.float32):
    """Block-wise CS sampling: Conv2d(l -> nB, kernel=B, stride=B, no bias)."""
    n, c, h, w = x.shape
    nB, c_w, B, B2 = weight.shape
    assert c == c_w and B == B2
    assert h % B == 0 and w % B == 0
    hb, wb = h // B, w // B

    # Cast to the MXU compute dtype BEFORE extraction so the transpose pass
    # moves 2 B/elem (bf16) and no separate cast pass is materialized.
    xc = x.astype(compute_dtype)
    wc = weight.astype(compute_dtype)

    # Patch extraction: NCHW -> (M, K), K ordered (c, ph, pw) to match the
    # PyTorch Conv2d OIHW weight flattening.
    # TODO(synk): fuse this extraction into the Pallas kernel (BlockSpec
    # walking raw NCHW (n, hb) strips + in-VMEM regroup) so the activations
    # cross HBM exactly once instead of read+write+read.
    patches = xc.reshape(n, c, hb, B, wb, B)
    patches = patches.transpose(0, 2, 4, 1, 3, 5)
    patches = patches.reshape(n * hb * wb, c * B * B)

    # Conv weight as a (K, nB) matrix.
    w_t = wc.reshape(nB, c * B * B).T

    y = patch_matmul(patches, w_t, out_dtype=out_dtype)       # (M, nB)
    y = y.reshape(n, hb, wb, nB).transpose(0, 3, 1, 2)        # NCHW
    return y


class SamplingBlock:
    """JAX/Pallas port of the PyTorch SamplingBlock (block-wise CS sampling)."""

    def __init__(self, B=32, l=1, r=0.1, key=None):
        self.B = B
        self.l = l
        # int() truncation matches PyTorch's int(r * l * B**2) (intentional).
        self.nB = int(r * l * B ** 2)
        # Deterministic weight init, same shape as nn.Conv2d weight (nB,l,B,B)
        # and PyTorch's default kaiming-uniform bound.
        fan_in = l * B * B
        bound = 1.0 / float(fan_in) ** 0.5
        key = jax.random.PRNGKey(42) if key is None else key
        self.weight = jax.random.uniform(
            key, (self.nB, l, B, B), minval=-bound, maxval=bound,
            dtype=jnp.float32)

    def __call__(self, x):
        return sampling_forward(x, self.weight)


def _reference_conv(x, weight, B):
    # Plain-XLA reference: Conv2d, stride=B, no padding, no bias (NCHW, OIHW).
    return lax.conv_general_dilated(
        x, weight, window_strides=(B, B), padding="VALID",
        dimension_numbers=("NCHW", "OIHW", "NCHW"))


if __name__ == "__main__":
    key = jax.random.PRNGKey(0)
    kx1, kw1, kx2, kw2, kx3, kw3 = jax.random.split(key, 6)

    # Case 1: module defaults (B=32, l=1, r=0.1 -> nB=102); tiny M -> 1 step.
    blk1 = SamplingBlock(B=32, l=1, r=0.1, key=kw1)
    x1 = jax.random.normal(kx1, (2, 1, 64, 64), dtype=jnp.float32)
    y1 = jax.block_until_ready(blk1(x1))
    y1_ref = jax.block_until_ready(_reference_conv(x1, blk1.weight, blk1.B))
    assert y1.shape == y1_ref.shape == (2, blk1.nB, 2, 2)
    # bf16 operands => loosened tolerance vs. the f32 XLA conv reference.
    assert jnp.allclose(y1, y1_ref, atol=5e-2, rtol=5e-2)

    # Case 2: M=300 -> tm=160, 2 grid steps (v7x-friendly), N padded 32->128.
    blk2 = SamplingBlock(B=8, l=2, r=0.25, key=kw2)
    x2 = jax.random.normal(kx2, (3, 2, 80, 80), dtype=jnp.float32)
    y2 = jax.block_until_ready(blk2(x2))
    y2_ref = jax.block_until_ready(_reference_conv(x2, blk2.weight, blk2.B))
    assert y2.shape == y2_ref.shape == (3, blk2.nB, 10, 10)
    assert jnp.allclose(y2, y2_ref, atol=5e-2, rtol=5e-2)

    # Case 3: M=3072 -> exercises the full tm=1024 tile (3 grid steps).
    blk3 = SamplingBlock(B=8, l=1, r=0.25, key=kw3)
    x3 = jax.random.normal(kx3, (3, 1, 256, 256), dtype=jnp.float32)
    y3 = jax.block_until_ready(blk3(x3))
    y3_ref = jax.block_until_ready(_reference_conv(x3, blk3.weight, blk3.B))
    assert y3.shape == y3_ref.shape == (3, blk3.nB, 32, 32)
    assert jnp.allclose(y3, y3_ref, atol=5e-2, rtol=5e-2)

    print("KERNEL_OK")
</pallas_src>

<mosaic_0001>
module attributes {stable_mosaic.version = 11 : i64} {
  func.func @_sampling_matmul_kernel(%arg0: i32, %arg1: memref<16x1024xbf16, #tpu.memory_space<vmem>>, %arg2: memref<1024x128xbf16, #tpu.memory_space<vmem>>, %arg3: memref<16x128xf32, #tpu.memory_space<vmem>>) attributes {dimension_semantics = [#tpu.dimension_semantics<parallel>], iteration_bounds = array<i64: 1>, scalar_prefetch = 0 : i64, scratch_operands = 0 : i64, tpu.core_type = #tpu.core_type<tc>, window_params = [{transform_indices = @transform_0, window_bounds = array<i64: 16, 1024>}, {pipeline_mode = #tpu.pipeline_mode<synchronous>, transform_indices = @transform_1, window_bounds = array<i64: 1024, 128>}, {transform_indices = @transform_2, window_bounds = array<i64: 16, 128>}]} {
    %c0 = arith.constant 0 : index
    %c0_0 = arith.constant 0 : index
    %0 = vector.load %arg1[%c0, %c0_0] : memref<16x1024xbf16, #tpu.memory_space<vmem>>, vector<16x1024xbf16>
    %c0_1 = arith.constant 0 : index
    %c0_2 = arith.constant 0 : index
    %1 = vector.load %arg2[%c0_1, %c0_2] : memref<1024x128xbf16, #tpu.memory_space<vmem>>, vector<1024x128xbf16>
    %cst = arith.constant dense<0.000000e+00> : vector<16x128xf32>
    %2 = tpu.matmul %0, %1, %cst {dimension_numbers = #tpu.dot_dimension_numbers<[1], [0], [0], [1], [0, 0, 1, 1], [], []>} : vector<16x1024xbf16>, vector<1024x128xbf16>, vector<16x128xf32> -> vector<16x128xf32>
    %c0_3 = arith.constant 0 : index
    %c0_4 = arith.constant 0 : index
    %3 = vector.load %arg3[%c0_3, %c0_4] : memref<16x128xf32, #tpu.memory_space<vmem>>, vector<16x128xf32>
    tpu.vector_store %arg3[%c0_3, %c0_4], %2 {strides = array<i32>} : memref<16x128xf32, #tpu.memory_space<vmem>>, vector<16x128xf32>,
    return
  }
  func.func @transform_0(%arg0: i32) -> (i32, i32) {
    %c0_i32 = arith.constant 0 : i32
    %c0_i32_0 = arith.constant 0 : i32
    return %arg0, %c0_i32 : i32, i32
  }
  func.func @transform_1(%arg0: i32) -> (i32, i32) {
    %c0_i32 = arith.constant 0 : i32
    %c0_i32_0 = arith.constant 0 : i32
    %c0_i32_1 = arith.constant 0 : i32
    return %c0_i32, %c0_i32_0 : i32, i32
  }
  func.func @transform_2(%arg0: i32) -> (i32, i32) {
    %c0_i32 = arith.constant 0 : i32
    %c0_i32_0 = arith.constant 0 : i32
    return %arg0, %c0_i32 : i32, i32
  }
}

</mosaic_0001>

<bundles_post_ra>
// kernel: sampling_forward.1
= control target key start
LH: loop header
LB: loop body
LE: loop exit
PB: predicated region body
PF: predicated region fallthrough
CT: control target
= control target key end

     0   :  { %s1310_s1 = inlined_call_operand.vmem [shape: bf16[1024,128], index: 1, kind: input, shape index: {}]   ;;  %s1311_s0 = inlined_call_operand.vmem [shape: bf16[16,1024], index: 0, kind: input, shape index: {}]   ;;  %s1312_s2 = inlined_call_operand.vmem [shape: f32[16,128], index: 2, kind: output, shape index: {}]  }
   0x1   :  { %v992_v0 = vld [vmem:[%s1310_s1 + $0x38] sm:$0xff]  ;;  %v991_v4 = vld [vmem:[%s1310_s1 + $0x30] sm:$0xff]  ;;  %v990_v8 = vld [vmem:[%s1310_s1 + $0x28] sm:$0xff] }
   0x2   :  { %v1000_v1 = vld [vmem:[%s1310_s1 + $0x78] sm:$0xff]  ;;  %571 = vmatpush.bf16.msra.mxu0 %v992_v0  ;;  %v999_v5 = vld [vmem:[%s1310_s1 + $0x70] sm:$0xff]  ;;  %v998_v9 = vld [vmem:[%s1310_s1 + $0x68] sm:$0xff] }
   0x3   :  { %v1008_v2 = vld [vmem:[%s1310_s1 + $0xb8] sm:$0xff]  ;;  %585 = vmatpush.bf16.msra.mxu1 %v1000_v1  ;;  %v1007_v6 = vld [vmem:[%s1310_s1 + $0xb0] sm:$0xff]  ;;  %v1006_v10 = vld [vmem:[%s1310_s1 + $0xa8] sm:$0xff] }
   0x4   :  { %v1016_v3 = vld [vmem:[%s1310_s1 + $0xf8] sm:$0xff]  ;;  %599 = vmatpush.bf16.msra.mxu2 %v1008_v2  ;;  %v1015_v7 = vld [vmem:[%s1310_s1 + $0xf0] sm:$0xff]  ;;  %v1014_v11 = vld [vmem:[%s1310_s1 + $0xe8] sm:$0xff] }
   0x5   :  { %613 = vmatpush.bf16.msra.mxu3 %v1016_v3  ;;  %v989_v12 = vld [vmem:[%s1310_s1 + $0x20] sm:$0xff]  ;;  %v988_v16 = vld [vmem:[%s1310_s1 + $0x18] sm:$0xff]  ;;  %v987_v20 = vld [vmem:[%s1310_s1 + $0x10] sm:$0xff] }
   0x6   :  { %572 = vmatpush.bf16.msra.mxu0 %v991_v4  ;;  %v997_v13 = vld [vmem:[%s1310_s1 + $0x60] sm:$0xff]  ;;  %v996_v17 = vld [vmem:[%s1310_s1 + $0x58] sm:$0xff]  ;;  %v995_v21 = vld [vmem:[%s1310_s1 + $0x50] sm:$0xff] }
   0x7   :  { %586 = vmatpush.bf16.msra.mxu1 %v999_v5  ;;  %v1005_v14 = vld [vmem:[%s1310_s1 + $0xa0] sm:$0xff]  ;;  %v1004_v18 = vld [vmem:[%s1310_s1 + $0x98] sm:$0xff]  ;;  %v1003_v22 = vld [vmem:[%s1310_s1 + $0x90] sm:$0xff] }
   0x8   :  { %600 = vmatpush.bf16.msra.mxu2 %v1007_v6  ;;  %v1013_v15 = vld [vmem:[%s1310_s1 + $0xe0] sm:$0xff]  ;;  %v1012_v19 = vld [vmem:[%s1310_s1 + $0xd8] sm:$0xff]  ;;  %v1011_v23 = vld [vmem:[%s1310_s1 + $0xd0] sm:$0xff] }
   0x9   :  { %614 = vmatpush.bf16.msra.mxu3 %v1015_v7  ;;  %v986_v24 = vld [vmem:[%s1310_s1 + $0x8] sm:$0xff]  ;;  %v985_v28 = vld [vmem:[%s1310_s1] sm:$0xff]  ;;  %v1024_v32 = vld [vmem:[%s1310_s1 + $0x138] sm:$0xff] }
   0xa   :  { %573 = vmatpush.bf16.msra.mxu0 %v990_v8  ;;  %v994_v25 = vld [vmem:[%s1310_s1 + $0x48] sm:$0xff]  ;;  %v993_v29 = vld [vmem:[%s1310_s1 + $0x40] sm:$0xff]  ;;  %v1032_v33 = vld [vmem:[%s1310_s1 + $0x178] sm:$0xff] }
   0xb   :  { %587 = vmatpush.bf16.msra.mxu1 %v998_v9  ;;  %v1002_v26 = vld [vmem:[%s1310_s1 + $0x88] sm:$0xff]  ;;  %v1001_v30 = vld [vmem:[%s1310_s1 + $0x80] sm:$0xff]  ;;  %v1040_v42 = vld [vmem:[%s1310_s1 + $0x1b8] sm:$0xff] }
   0xc   :  { %601 = vmatpush.bf16.msra.mxu2 %v1006_v10  ;;  %v1010_v27 = vld [vmem:[%s1310_s1 + $0xc8] sm:$0xff]  ;;  %v1009_v31 = vld [vmem:[%s1310_s1 + $0xc0] sm:$0xff]  ;;  %v1048_v43 = vld [vmem:[%s1310_s1 + $0x1f8] sm:$0xff] }
   0xd   :  { %615 = vmatpush.bf16.msra.mxu3 %v1014_v11  ;;  %v699_v34 = vld [vmem:[%s1311_s0 + $0x8] sm:$0xf]  ;;  %v978_v36 = vld [vmem:[%s1311_s0 + $0xc] sm:$0xf]  ;;  %v691_v38 = vld [vmem:[%s1311_s0] sm:$0xf] }
   0xe   :  { %574 = vmatpush.bf16.msra.mxu0 %v989_v12  ;;  %v982_v35 = vld [vmem:[%s1311_s0 + $0x24] sm:$0xf0]  ;;  %v701_v37 = vld [vmem:[%s1311_s0 + $0x28] sm:$0xf0]  ;;  %v981_v39 = vld [vmem:[%s1311_s0 + $0x1c] sm:$0xf0] }
   0xf   :  { %588 = vmatpush.bf16.msra.mxu1 %v997_v13  ;;  %v977_v40 = vld [vmem:[%s1311_s0 + $0x4] sm:$0xf]  ;;  %v700_v44 = vor.u32 %v982_v35, %v699_v34  ;;  %v704_v45 = vor.u32 %v978_v36, %v701_v37  ;;  %v692_v46 = vor.u32 %v981_v39, %v691_v38  ;;  %v1023_v48 = vld [vmem:[%s1310_s1 + $0x130] sm:$0xff]  ;;  %v1022_v52 = vld [vmem:[%s1310_s1 + $0x128] sm:$0xff] }
  0x10   :  { %602 = vmatpush.bf16.msra.mxu2 %v1005_v14  ;;  %v693_v41 = vld [vmem:[%s1311_s0 + $0x20] sm:$0xf0]  ;;  %v1031_v49 = vld [vmem:[%s1310_s1 + $0x170] sm:$0xff]  ;;  %v1030_v53 = vld [vmem:[%s1310_s1 + $0x168] sm:$0xff] }
  0x11   :  { %616 = vmatpush.bf16.msra.mxu3 %v1013_v15  ;;  %v696_v47 = vor.u32 %v977_v40, %v693_v41  ;;  %v1039_v50 = vld [vmem:[%s1310_s1 + $0x1b0] sm:$0xff]  ;;  %v1038_v54 = vld [vmem:[%s1310_s1 + $0x1a8] sm:$0xff]  ;;  %v1021_v56 = vld [vmem:[%s1310_s1 + $0x120] sm:$0xff] }
  0x12   :  { %575 = vmatpush.bf16.msra.mxu0 %v988_v16  ;;  %v1047_v51 = vld [vmem:[%s1310_s1 + $0x1f0] sm:$0xff]  ;;  %v1046_v55 = vld [vmem:[%s1310_s1 + $0x1e8] sm:$0xff]  ;;  %v1029_v57 = vld [vmem:[%s1310_s1 + $0x160] sm:$0xff] }
  0x13   :  { %589 = vmatpush.bf16.msra.mxu1 %v996_v17  ;;  %v1037_v58 = vld [vmem:[%s1310_s1 + $0x1a0] sm:$0xff]  ;;  %v1020_v60 = vld [vmem:[%s1310_s1 + $0x118] sm:$0xff]  ;;  %v1019_v0 = vld [vmem:[%s1310_s1 + $0x110] sm:$0xff] }
  0x14   :  { %603 = vmatpush.bf16.msra.mxu2 %v1004_v18  ;;  %v1045_v59 = vld [vmem:[%s1310_s1 + $0x1e0] sm:$0xff]  ;;  %v1028_v61 = vld [vmem:[%s1310_s1 + $0x158] sm:$0xff]  ;;  %v1027_v1 = vld [vmem:[%s1310_s1 + $0x150] sm:$0xff] }
  0x15   :  { %617 = vmatpush.bf16.msra.mxu3 %v1012_v19  ;;  %v1036_v62 = vld [vmem:[%s1310_s1 + $0x198] sm:$0xff]  ;;  %v1035_v2 = vld [vmem:[%s1310_s1 + $0x190] sm:$0xff]  ;;  %v1018_v4 = vld [vmem:[%s1310_s1 + $0x108] sm:$0xff] }
  0x16   :  { %576 = vmatpush.bf16.msra.mxu0 %v987_v20  ;;  %v1044_v63 = vld [vmem:[%s1310_s1 + $0x1d8] sm:$0xff]  ;;  %v1043_v3 = vld [vmem:[%s1310_s1 + $0x1d0] sm:$0xff]  ;;  %v1026_v5 = vld [vmem:[%s1310_s1 + $0x148] sm:$0xff] }
  0x17   :  { %590 = vmatpush.bf16.msra.mxu1 %v995_v21  ;;  %v1034_v6 = vld [vmem:[%s1310_s1 + $0x188] sm:$0xff]  ;;  %v1017_v8 = vld [vmem:[%s1310_s1 + $0x100] sm:$0xff]  ;;  %v707_v12 = vld [vmem:[%s1311_s0 + $0x10] sm:$0xf] }
  0x18   :  { %604 = vmatpush.bf16.msra.mxu2 %v1003_v22  ;;  %v1042_v7 = vld [vmem:[%s1310_s1 + $0x1c8] sm:$0xff]  ;;  %v1025_v9 = vld [vmem:[%s1310_s1 + $0x140] sm:$0xff]  ;;  %v983_v13 = vld [vmem:[%s1311_s0 + $0x2c] sm:$0xf0] }
  0x19   :  { %618 = vmatpush.bf16.msra.mxu3 %v1011_v23  ;;  %v1033_v10 = vld [vmem:[%s1310_s1 + $0x180] sm:$0xff]  ;;  %v979_v14 = vld [vmem:[%s1311_s0 + $0x14] sm:$0xf]  ;;  %v715_v16 = vld [vmem:[%s1311_s0 + $0x18] sm:$0xf]  ;;  %v708_v20 = vor.u32 %v983_v13, %v707_v12 }
  0x1a   :  { %577 = vmatpush.bf16.msra.mxu0 %v986_v24  ;;  %v1041_v11 = vld [vmem:[%s1310_s1 + $0x1c0] sm:$0xff]  ;;  %v709_v15 = vld [vmem:[%s1311_s0 + $0x30] sm:$0xf0]  ;;  %v984_v17 = vld [vmem:[%s1311_s0 + $0x34] sm:$0xf0] }
  0x1b   :  { %591 = vmatpush.bf16.msra.mxu1 %v994_v25  ;;  %v980_v18 = vld [vmem:[%s1311_s0 + $0x1c] sm:$0xf]  ;;  %v712_v21 = vor.u32 %v979_v14, %v709_v15  ;;  %v716_v22 = vor.u32 %v984_v17, %v715_v16 }
  0x1c   :  { %605 = vmatpush.bf16.msra.mxu2 %v1002_v26  ;;  %v717_v19 = vld [vmem:[%s1311_s0 + $0x38] sm:$0xf0] }
  0x1d   :  { %619 = vmatpush.bf16.msra.mxu3 %v1010_v27  ;;  %v720_v23 = vor.u32 %v980_v18, %v717_v19 }
  0x1e   :  { %578 = vmatpush.bf16.msra.mxu0 %v985_v28 }
  0x1f   :  { %592 = vmatpush.bf16.msra.mxu1 %v993_v29 }
  0x20   :  { %606 = vmatpush.bf16.msra.mxu2 %v1001_v30 }
  0x21   :  { %620 = vmatpush.bf16.msra.mxu3 %v1009_v31  ;;  %579 = vmatmul.bf16.vlgmr.msra.gmra.mxu0 %v692_v46 }
  0x22   :  { %627 = vmatpush.bf16.msrb.mxu0 %v1024_v32  ;;  %593 = vmatmul.bf16.vlgmr.msra.gmra.mxu1 %v696_v47 }
  0x23   :  { %641 = vmatpush.bf16.msrb.mxu1 %v1032_v33  ;;  %607 = vmatmul.bf16.vlgmr.msra.gmra.mxu2 %v700_v44 }
  0x24   :  { %655 = vmatpush.bf16.msrb.mxu2 %v1040_v42  ;;  %621 = vmatmul.bf16.vlgmr.msra.gmra.mxu3 %v704_v45 }
  0x25   :  { %669 = vmatpush.bf16.msrb.mxu3 %v1048_v43 }
  0x26   :  { %628 = vmatpush.bf16.msrb.mxu0 %v1023_v48 }
  0x27   :  { %642 = vmatpush.bf16.msrb.mxu1 %v1031_v49 }
  0x28   :  { %656 = vmatpush.bf16.msrb.mxu2 %v1039_v50 }
  0x29   :  { %670 = vmatpush.bf16.msrb.mxu3 %v1047_v51 }
  0x2a   :  { %629 = vmatpush.bf16.msrb.mxu0 %v1022_v52 }
  0x2b   :  { %643 = vmatpush.bf16.msrb.mxu1 %v1030_v53 }
  0x2c   :  { %657 = vmatpush.bf16.msrb.mxu2 %v1038_v54 }
  0x2d   :  { %671 = vmatpush.bf16.msrb.mxu3 %v1046_v55 }
  0x2e   :  { %630 = vmatpush.bf16.msrb.mxu0 %v1021_v56 }
  0x2f   :  { %644 = vmatpush.bf16.msrb.mxu1 %v1029_v57 }
  0x30   :  { %658 = vmatpush.bf16.msrb.mxu2 %v1037_v58 }
  0x31   :  { %672 = vmatpush.bf16.msrb.mxu3 %v1045_v59 }
  0x32   :  { %631 = vmatpush.bf16.msrb.mxu0 %v1020_v60 }
  0x33   :  { %645 = vmatpush.bf16.msrb.mxu1 %v1028_v61 }
  0x34   :  { %659 = vmatpush.bf16.msrb.mxu2 %v1036_v62 }
  0x35   :  { %673 = vmatpush.bf16.msrb.mxu3 %v1044_v63 }
  0x36   :  { %632 = vmatpush.bf16.msrb.mxu0 %v1019_v0 }
  0x37   :  { %646 = vmatpush.bf16.msrb.mxu1 %v1027_v1 }
  0x38   :  { %660 = vmatpush.bf16.msrb.mxu2 %v1035_v2 }
  0x39   :  { %674 = vmatpush.bf16.msrb.mxu3 %v1043_v3 }
  0x3a   :  { %633 = vmatpush.bf16.msrb.mxu0 %v1018_v4 }
  0x3b   :  { %647 = vmatpush.bf16.msrb.mxu1 %v1026_v5 }
  0x3c   :  { %661 = vmatpush.bf16.msrb.mxu2 %v1034_v6 }
  0x3d   :  { %675 = vmatpush.bf16.msrb.mxu3 %v1042_v7 }
  0x3e   :  { %634 = vmatpush.bf16.msrb.mxu0 %v1017_v8 }
  0x3f   :  { %648 = vmatpush.bf16.msrb.mxu1 %v1025_v9 }
  0x40   :  { %662 = vmatpush.bf16.msrb.mxu2 %v1033_v10 }
  0x41   :  { %676 = vmatpush.bf16.msrb.mxu3 %v1041_v11  ;;  %635 = vmatmul.bf16.vlgmr.msrb.gmra.mxu0 %v708_v20 }
  0x42   :  { %649 = vmatmul.bf16.vlgmr.msrb.gmra.mxu1 %v712_v21 }
  0x43   :  { %663 = vmatmul.bf16.vlgmr.msrb.gmra.mxu2 %v716_v22 }
  0x44   :  { %677 = vmatmul.bf16.vlgmr.msrb.gmra.mxu3 %v720_v23 }
  0x9e   :  { %v580_v24 = vpop.f32.mrf.mxu0 }
  0x9f   :  { %v594_v25 = vpop.f32.mrf.mxu1 }
  0xa0   :  { %v595_v28 = vadd.f32 %v594_v25, %v580_v24 }
  0xa6   :  { %v608_v26 = vpop.f32.mrf.mxu2  ;;  %v582_v29 = vpop.f32.mrf.mxu0 }
  0xa7   :  { %v622_v27 = vpop.f32.mrf.mxu3  ;;  %v596_v30 = vpop.f32.mrf.mxu1  ;;  %v609_v31 = vadd.f32 %v608_v26, %v595_v28 }
  0xa8   :  { %v597_v35 = vadd.f32 %v596_v30, %v582_v29 }
  0xa9   :  { %v623_v34 = vadd.f32 %v622_v27, %v609_v31 }
  0xae   :  { %v610_v32 = vpop.f32.mrf.mxu2 }
  0xaf   :  { %v624_v33 = vpop.f32.mrf.mxu3  ;;  %v611_v39 = vadd.f32 %v610_v32, %v597_v35 }
  0xb1   :  { %v625_v43 = vadd.f32 %v624_v33, %v611_v39 }
  0xbe   :  { %v636_v36 = vpop.f32.mrf.mxu0 }
  0xbf   :  { %v637_v37 = vadd.f32 %v636_v36, %v623_v34  ;;  %v650_v38 = vpop.f32.mrf.mxu1 }
  0xc1   :  { %v651_v40 = vadd.f32 %v650_v38, %v637_v37 }
  0xc6   :  { %v664_v41 = vpop.f32.mrf.mxu2  ;;  %v638_v45 = vpop.f32.mrf.mxu0 }
  0xc7   :  { %v678_v42 = vpop.f32.mrf.mxu3  ;;  %v665_v44 = vadd.f32 %v664_v41, %v651_v40  ;;  %v639_v47 = vadd.f32 %v638_v45, %v625_v43  ;;  %v652_v48 = vpop.f32.mrf.mxu1 }
  0xc9   :  { %v679_v46 = vadd.f32 %v678_v42, %v665_v44  ;;  %v653_v49 = vadd.f32 %v652_v48, %v639_v47 }
  0xcb   :  { %683 = vst [vmem:[%s1312_s2] sm:$0xff] %v679_v46 }
  0xce   :  { %v666_v50 = vpop.f32.mrf.mxu2 }
  0xcf   :  { %v667_v51 = vadd.f32 %v666_v50, %v653_v49  ;;  %v680_v52 = vpop.f32.mrf.mxu3 }
  0xd1   :  { %v681_v53 = vadd.f32 %v680_v52, %v667_v51 }
  0xd3   :  { %684 = vst [vmem:[%s1312_s2 + $0x8] sm:$0xff] %v681_v53 }

</bundles_post_ra>
